<compile_context>
chip_gen: v6e
topology: v6e:2x2x1
jax: 0.10.0
libtpu: 0.0.40
codegen_flags: <defaults>
</compile_context>

<pallas_src>
import functools

import jax
import jax.numpy as jnp
from jax.experimental import pallas as pl
from jax.experimental.pallas import tpu as pltpu

LN_EPS = 1e-5  # nn.LayerNorm default


def _round_up(n, m):
    return ((n + m - 1) // m) * m


def mlp_kernel(x_ref, w1_ref, b1_ref, g_ref, beta_ref, w2t_ref, b2_ref, o_ref):
    # Cast the activation tile to the MXU operand dtype in-kernel: the cast rides on VPU
    # slack and avoids a separate wrapper-side pad/convert pass over x in HBM.
    x = x_ref[...].astype(w1_ref.dtype)

    # fc1: [tb, In] @ [In, Hid] on the MXU, f32 accumulation.
    h = jnp.dot(x, w1_ref[...], preferred_element_type=jnp.float32)
    h = h + b1_ref[...]

    # LayerNorm over the hidden (last) dim, single pass (E[h^2] - E[h]^2): the two
    # lane-reductions are independent so they can dual-issue on the XLUs, instead of the
    # serialized mean -> subtract -> square -> reduce chain. Elementwise math stays in f32
    # (v5e has no bf16 VPU/EUP; also matches the reference module numerics).
    inv_n = 1.0 / h.shape[-1]
    s1 = jnp.sum(h, axis=-1, keepdims=True) * inv_n        # E[h]
    s2 = jnp.sum(h * h, axis=-1, keepdims=True) * inv_n    # E[h^2]
    var = s2 - s1 * s1
    h = (h - s1) * jax.lax.rsqrt(var + LN_EPS)
    h = h * g_ref[...] + beta_ref[...]

    # ReLU
    h = jnp.maximum(h, 0.0)

    # Dropout (eval mode): identity.

    # fc2 emitted lane-major on batch: [Out, Hid] . [tb, Hid]^T -> [Out, tb]
    # (contract-on-last-of-both, the A @ B^T MXU form used by flash attention). Keeps the
    # output stores lane-dense and skips padded-lane sigmoids when Out is tiny (e.g. 1).
    y = jax.lax.dot_general(
        w2t_ref[...],
        h.astype(w2t_ref.dtype),
        dimension_numbers=(((1,), (1,)), ((), ())),
        preferred_element_type=jnp.float32,
    )
    y = y + b2_ref[...]

    # Sigmoid via the tanh form -> the transcendental lands on the EUP slot instead of the
    # VALU/long-latency divide path.
    o_ref[...] = (0.5 * (jnp.tanh(0.5 * y) + 1.0)).astype(o_ref.dtype)


@functools.partial(jax.jit, static_argnames=("tb", "matmul_dtype"))
def mlp_forward(x, w1, b1, gamma, beta, w2, b2, *, tb=128, matmul_dtype=jnp.bfloat16):
    """Expert-MLP forward.

    tb: batch tile (multiple of 8). Default 128 so e.g. B=512 gives a 4-step grid:
        >=2 pipelined steps per TensorCore on v7x megacore and 4 steps on single-core
        v5e/v6e, so the x-tile DMA overlaps compute instead of being fully exposed.
    matmul_dtype: MXU operand dtype (default bf16 -> native MXU rate, half the weight DMA);
        LN/bias/sigmoid stay f32. x is cast inside the kernel, so no wrapper-side
        pad/convert pass over x is ever materialized in HBM.
    """
    B, In = x.shape
    Hid = w1.shape[1]
    Out = w2.shape[1]
    f32 = jnp.float32

    # Batch tile: multiple of 8 sublanes, clipped to the (rounded-up) batch.
    tb_eff = min(tb, _round_up(B, 8))
    B_p = _round_up(B, tb_eff)

    # x goes in unpadded along features (a full-extent last dim is a legal BlockSpec even
    # when In is not a multiple of 128); the batch is zero-padded only when it does not
    # divide the tile (padded rows stay row-local and are sliced off below).
    x_in = x if B_p == B else jnp.pad(x, ((0, B_p - B), (0, 0)))

    w1_c = w1.astype(matmul_dtype)                     # [In, Hid]
    w2t_c = jnp.transpose(w2).astype(matmul_dtype)     # [Out, Hid]
    b1_c = b1.reshape(1, Hid).astype(f32)
    g_c = gamma.reshape(1, Hid).astype(f32)
    be_c = beta.reshape(1, Hid).astype(f32)
    b2_c = b2.reshape(Out, 1).astype(f32)

    grid = (B_p // tb_eff,)

    # Weights/biases/LN params never change across the batch grid -> single-buffer them
    # (halves their VMEM footprint vs default double-buffering).
    const = pl.Buffered(1)

    x_itm = jnp.dtype(x.dtype).itemsize
    w_itm = jnp.dtype(matmul_dtype).itemsize
    cost = pl.CostEstimate(
        flops=2 * B_p * (In * Hid + Hid * Out),
        transcendentals=B_p * (Out + 1),  # tanh per output elem + rsqrt per row
        bytes_accessed=x_itm * B_p * In
        + w_itm * (In * Hid + Hid * Out)
        + 4 * (3 * Hid + Out + Out * B_p),
    )

    out_p = pl.pallas_call(
        mlp_kernel,
        out_shape=jax.ShapeDtypeStruct((Out, B_p), jnp.float32),
        grid=grid,
        in_specs=[
            pl.BlockSpec((tb_eff, In), lambda i: (i, 0)),                     # x batch tile
            pl.BlockSpec((In, Hid), lambda i: (0, 0), pipeline_mode=const),   # w1 (resident)
            pl.BlockSpec((1, Hid), lambda i: (0, 0), pipeline_mode=const),    # b1
            pl.BlockSpec((1, Hid), lambda i: (0, 0), pipeline_mode=const),    # LN gamma
            pl.BlockSpec((1, Hid), lambda i: (0, 0), pipeline_mode=const),    # LN beta
            pl.BlockSpec((Out, Hid), lambda i: (0, 0), pipeline_mode=const),  # w2^T (resident)
            pl.BlockSpec((Out, 1), lambda i: (0, 0), pipeline_mode=const),    # b2
        ],
        out_specs=pl.BlockSpec((Out, tb_eff), lambda i: (0, i)),
        compiler_params=pltpu.CompilerParams(
            # batch axis is independent -> shards across TensorCores (v7x megacore)
            dimension_semantics=("parallel",),
            # real footprint is ~1-2 MiB; a modest cap leaves headroom on v7x's 64 MiB VMEM
            vmem_limit_bytes=16 * 1024 * 1024,
        ),
        cost_estimate=cost,
    )(x_in, w1_c, b1_c, g_c, be_c, w2t_c, b2_c)

    # [Out, B_p] -> [B, Out]
    return out_p[:, :B].T


def init_params(key, input_size, hidden_size, output_size):
    """Deterministic init mimicking nn.Linear (uniform +-1/sqrt(fan_in)) and
    nn.LayerNorm (gamma=1, beta=0). Linear weights returned as [in, out]."""
    k1, k2, k3, k4 = jax.random.split(key, 4)
    lim1 = 1.0 / jnp.sqrt(input_size)
    lim2 = 1.0 / jnp.sqrt(hidden_size)
    w1 = jax.random.uniform(k1, (input_size, hidden_size), jnp.float32, -lim1, lim1)
    b1 = jax.random.uniform(k2, (1, hidden_size), jnp.float32, -lim1, lim1)
    w2 = jax.random.uniform(k3, (hidden_size, output_size), jnp.float32, -lim2, lim2)
    b2 = jax.random.uniform(k4, (1, output_size), jnp.float32, -lim2, lim2)
    gamma = jnp.ones((1, hidden_size), jnp.float32)
    beta = jnp.zeros((1, hidden_size), jnp.float32)
    return w1, b1, gamma, beta, w2, b2


def mlp_reference(x, w1, b1, gamma, beta, w2, b2):
    hi = jax.lax.Precision.HIGHEST
    h = jnp.dot(x, w1, precision=hi) + b1
    mean = jnp.mean(h, axis=-1, keepdims=True)
    var = jnp.mean((h - mean) ** 2, axis=-1, keepdims=True)
    h = (h - mean) / jnp.sqrt(var + LN_EPS)
    h = h * gamma + beta
    h = jnp.maximum(h, 0.0)
    y = jnp.dot(h, w2, precision=hi) + b2
    return jax.nn.sigmoid(y)


if __name__ == "__main__":
    key = jax.random.PRNGKey(0)
    kx, kp, krest = jax.random.split(key, 3)

    # --- small sanity shapes: exact f32 MXU path, strict check against the reference ---
    batch, input_size, hidden_size, output_size = 8, 32, 64, 16
    x = jax.random.normal(kx, (batch, input_size), jnp.float32)
    params = init_params(kp, input_size, hidden_size, output_size)
    out = jax.block_until_ready(mlp_forward(x, *params, matmul_dtype=jnp.float32))
    ref = mlp_reference(x, *params)
    assert out.shape == (batch, output_size)
    assert jnp.allclose(out, ref, atol=1e-4, rtol=0.0), "f32 mismatch vs reference"

    # --- realistic expert shape (2 transformers * 300 features, hidden=256, out=1):
    #     default bf16 MXU operands, tb=128 -> 4-step parallel grid over the batch ---
    batch2, in2, hid2, out2 = 512, 600, 256, 1
    kx2, kp2 = jax.random.split(krest)
    x2 = jax.random.normal(kx2, (batch2, in2), jnp.float32)
    params2 = init_params(kp2, in2, hid2, out2)
    y = jax.block_until_ready(mlp_forward(x2, *params2))
    y_ref = mlp_reference(x2, *params2)
    assert y.shape == (batch2, out2)
    assert jnp.allclose(y, y_ref, atol=5e-2, rtol=0.0), "bf16 mismatch vs reference"

    print("KERNEL_OK")
</pallas_src>

<mosaic_0001>
module attributes {stable_mosaic.version = 11 : i64} {
  func.func @mlp_kernel(%arg0: i32, %arg1: memref<8x32xf32, #tpu.memory_space<vmem>>, %arg2: memref<32x64xf32, #tpu.memory_space<vmem>>, %arg3: memref<1x64xf32, #tpu.memory_space<vmem>>, %arg4: memref<1x64xf32, #tpu.memory_space<vmem>>, %arg5: memref<1x64xf32, #tpu.memory_space<vmem>>, %arg6: memref<16x64xf32, #tpu.memory_space<vmem>>, %arg7: memref<16x1xf32, #tpu.memory_space<vmem>>, %arg8: memref<16x8xf32, #tpu.memory_space<vmem>>) attributes {dimension_semantics = [#tpu.dimension_semantics<parallel>], iteration_bounds = array<i64: 1>, scalar_prefetch = 0 : i64, scratch_operands = 0 : i64, tpu.core_type = #tpu.core_type<tc>, window_params = [{transform_indices = @transform_0, window_bounds = array<i64: 8, 32>}, {pipeline_mode = #tpu.pipeline_mode<synchronous>, transform_indices = @transform_1, window_bounds = array<i64: 32, 64>}, {pipeline_mode = #tpu.pipeline_mode<synchronous>, transform_indices = @transform_2, window_bounds = array<i64: 1, 64>}, {pipeline_mode = #tpu.pipeline_mode<synchronous>, transform_indices = @transform_3, window_bounds = array<i64: 1, 64>}, {pipeline_mode = #tpu.pipeline_mode<synchronous>, transform_indices = @transform_4, window_bounds = array<i64: 1, 64>}, {pipeline_mode = #tpu.pipeline_mode<synchronous>, transform_indices = @transform_5, window_bounds = array<i64: 16, 64>}, {pipeline_mode = #tpu.pipeline_mode<synchronous>, transform_indices = @transform_6, window_bounds = array<i64: 16, 1>}, {transform_indices = @transform_7, window_bounds = array<i64: 16, 8>}]} {
    %c0 = arith.constant 0 : index
    %c0_0 = arith.constant 0 : index
    %0 = vector.load %arg1[%c0, %c0_0] : memref<8x32xf32, #tpu.memory_space<vmem>>, vector<8x32xf32>
    %c0_1 = arith.constant 0 : index
    %c0_2 = arith.constant 0 : index
    %1 = vector.load %arg2[%c0_1, %c0_2] : memref<32x64xf32, #tpu.memory_space<vmem>>, vector<32x64xf32>
    %cst = arith.constant dense<0.000000e+00> : vector<8x64xf32>
    %2 = tpu.matmul %0, %1, %cst {dimension_numbers = #tpu.dot_dimension_numbers<[1], [0], [0], [1], [0, 0, 1, 1], [], []>} : vector<8x32xf32>, vector<32x64xf32>, vector<8x64xf32> -> vector<8x64xf32>
    %c0_3 = arith.constant 0 : index
    %c0_4 = arith.constant 0 : index
    %3 = vector.load %arg3[%c0_3, %c0_4] : memref<1x64xf32, #tpu.memory_space<vmem>>, vector<1x64xf32>
    %4 = vector.broadcast %3 : vector<1x64xf32> to vector<8x64xf32>
    %5 = arith.addf %2, %4 : vector<8x64xf32>
    %cst_5 = arith.constant dense<0.000000e+00> : vector<8xf32>
    %6 = vector.multi_reduction <add>, %5, %cst_5 [1] : vector<8x64xf32> to vector<8xf32>
    %7 = vector.shape_cast %6 : vector<8xf32> to vector<8x1xf32>
    %cst_6 = arith.constant 1.562500e-02 : f32
    %8 = vector.broadcast %cst_6 : f32 to vector<8x1xf32>
    %9 = arith.mulf %7, %8 : vector<8x1xf32>
    %10 = arith.mulf %5, %5 : vector<8x64xf32>
    %cst_7 = arith.constant dense<0.000000e+00> : vector<8xf32>
    %11 = vector.multi_reduction <add>, %10, %cst_7 [1] : vector<8x64xf32> to vector<8xf32>
    %12 = vector.shape_cast %11 : vector<8xf32> to vector<8x1xf32>
    %cst_8 = arith.constant 1.562500e-02 : f32
    %13 = vector.broadcast %cst_8 : f32 to vector<8x1xf32>
    %14 = arith.mulf %12, %13 : vector<8x1xf32>
    %15 = arith.mulf %9, %9 : vector<8x1xf32>
    %16 = arith.subf %14, %15 : vector<8x1xf32>
    %17 = vector.broadcast %9 : vector<8x1xf32> to vector<8x64xf32>
    %18 = arith.subf %5, %17 : vector<8x64xf32>
    %cst_9 = arith.constant 9.99999974E-6 : f32
    %19 = vector.broadcast %cst_9 : f32 to vector<8x1xf32>
    %20 = arith.addf %16, %19 : vector<8x1xf32>
    %21 = math.rsqrt %20 : vector<8x1xf32>
    %22 = vector.broadcast %21 : vector<8x1xf32> to vector<8x64xf32>
    %23 = arith.mulf %18, %22 : vector<8x64xf32>
    %c0_10 = arith.constant 0 : index
    %c0_11 = arith.constant 0 : index
    %24 = vector.load %arg4[%c0_10, %c0_11] : memref<1x64xf32, #tpu.memory_space<vmem>>, vector<1x64xf32>
    %25 = vector.broadcast %24 : vector<1x64xf32> to vector<8x64xf32>
    %26 = arith.mulf %23, %25 : vector<8x64xf32>
    %c0_12 = arith.constant 0 : index
    %c0_13 = arith.constant 0 : index
    %27 = vector.load %arg5[%c0_12, %c0_13] : memref<1x64xf32, #tpu.memory_space<vmem>>, vector<1x64xf32>
    %28 = vector.broadcast %27 : vector<1x64xf32> to vector<8x64xf32>
    %29 = arith.addf %26, %28 : vector<8x64xf32>
    %cst_14 = arith.constant 0.000000e+00 : f32
    %30 = vector.broadcast %cst_14 : f32 to vector<8x64xf32>
    %31 = arith.maximumf %29, %30 : vector<8x64xf32>
    %c0_15 = arith.constant 0 : index
    %c0_16 = arith.constant 0 : index
    %32 = vector.load %arg6[%c0_15, %c0_16] : memref<16x64xf32, #tpu.memory_space<vmem>>, vector<16x64xf32>
    %cst_17 = arith.constant dense<0.000000e+00> : vector<16x8xf32>
    %33 = tpu.matmul %32, %31, %cst_17 {dimension_numbers = #tpu.dot_dimension_numbers<[1], [1], [0], [0], [0, 0, 1, 0], [], []>} : vector<16x64xf32>, vector<8x64xf32>, vector<16x8xf32> -> vector<16x8xf32>
    %c0_18 = arith.constant 0 : index
    %c0_19 = arith.constant 0 : index
    %34 = vector.load %arg7[%c0_18, %c0_19] : memref<16x1xf32, #tpu.memory_space<vmem>>, vector<16x1xf32>
    %35 = vector.broadcast %34 : vector<16x1xf32> to vector<16x8xf32>
    %36 = arith.addf %33, %35 : vector<16x8xf32>
    %cst_20 = arith.constant 5.000000e-01 : f32
    %37 = vector.broadcast %cst_20 : f32 to vector<16x8xf32>
    %38 = arith.mulf %37, %36 : vector<16x8xf32>
    %39 = math.tanh %38 : vector<16x8xf32>
    %cst_21 = arith.constant 1.000000e+00 : f32
    %40 = vector.broadcast %cst_21 : f32 to vector<16x8xf32>
    %41 = arith.addf %39, %40 : vector<16x8xf32>
    %cst_22 = arith.constant 5.000000e-01 : f32
    %42 = vector.broadcast %cst_22 : f32 to vector<16x8xf32>
    %43 = arith.mulf %42, %41 : vector<16x8xf32>
    %c0_23 = arith.constant 0 : index
    %c0_24 = arith.constant 0 : index
    %44 = vector.load %arg8[%c0_23, %c0_24] : memref<16x8xf32, #tpu.memory_space<vmem>>, vector<16x8xf32>
    tpu.vector_store %arg8[%c0_23, %c0_24], %43 {strides = array<i32>} : memref<16x8xf32, #tpu.memory_space<vmem>>, vector<16x8xf32>,
    return
  }
  func.func @transform_0(%arg0: i32) -> (i32, i32) {
    %c0_i32 = arith.constant 0 : i32
    %c0_i32_0 = arith.constant 0 : i32
    return %arg0, %c0_i32 : i32, i32
  }
  func.func @transform_1(%arg0: i32) -> (i32, i32) {
    %c0_i32 = arith.constant 0 : i32
    %c0_i32_0 = arith.constant 0 : i32
    %c0_i32_1 = arith.constant 0 : i32
    return %c0_i32, %c0_i32_0 : i32, i32
  }
  func.func @transform_2(%arg0: i32) -> (i32, i32) {
    %c0_i32 = arith.constant 0 : i32
    %c0_i32_0 = arith.constant 0 : i32
    %c0_i32_1 = arith.constant 0 : i32
    return %c0_i32, %c0_i32_0 : i32, i32
  }
  func.func @transform_3(%arg0: i32) -> (i32, i32) {
    %c0_i32 = arith.constant 0 : i32
    %c0_i32_0 = arith.constant 0 : i32
    %c0_i32_1 = arith.constant 0 : i32
    return %c0_i32, %c0_i32_0 : i32, i32
  }
  func.func @transform_4(%arg0: i32) -> (i32, i32) {
    %c0_i32 = arith.constant 0 : i32
    %c0_i32_0 = arith.constant 0 : i32
    %c0_i32_1 = arith.constant 0 : i32
    return %c0_i32, %c0_i32_0 : i32, i32
  }
  func.func @transform_5(%arg0: i32) -> (i32, i32) {
    %c0_i32 = arith.constant 0 : i32
    %c0_i32_0 = arith.constant 0 : i32
    %c0_i32_1 = arith.constant 0 : i32
    return %c0_i32, %c0_i32_0 : i32, i32
  }
  func.func @transform_6(%arg0: i32) -> (i32, i32) {
    %c0_i32 = arith.constant 0 : i32
    %c0_i32_0 = arith.constant 0 : i32
    %c0_i32_1 = arith.constant 0 : i32
    return %c0_i32, %c0_i32_0 : i32, i32
  }
  func.func @transform_7(%arg0: i32) -> (i32, i32) {
    %c0_i32 = arith.constant 0 : i32
    %c0_i32_0 = arith.constant 0 : i32
    return %c0_i32, %arg0 : i32, i32
  }
}

</mosaic_0001>

<bundles_post_ra>
// kernel: mlp_forward.1
= control target key start
LH: loop header
LB: loop body
LE: loop exit
PB: predicated region body
PF: predicated region fallthrough
CT: control target
= control target key end

     0   :  { %12 = vsyncpa [#allocation3], 0  ;;  %s340_s24 = smov [#allocation2]   ;;  %s425_s0 = inlined_call_operand.vmem [shape: f32[8,32], index: 0, kind: input, shape index: {}]   ;;  %s426_s1 = inlined_call_operand.hbm [shape: f32[32,64], index: 1, kind: input, shape index: {}]   ;;  %s427_s2 = inlined_call_operand.vmem [shape: f32[1,64], index: 2, kind: input, shape index: {}]   ;;  %s428_s3 = inlined_call_operand.vmem [shape: f32[1,64], index: 3, kind: input, shape index: {}]   ;;  %s429_s4 = inlined_call_operand.vmem [shape: f32[1,64], index: 4, kind: input, shape index: {}]   ;;  %s430_s5 = inlined_call_operand.vmem [shape: f32[16,64], index: 5, kind: input, shape index: {}]   ;;  %s431_s6 = inlined_call_operand.vmem [shape: f32[16,1], index: 6, kind: input, shape index: {}]   ;;  %s432_s7 = inlined_call_operand.vmem [shape: f32[16,8], index: 7, kind: output, shape index: {}]  }
   0x1   :  { %s20_s25 = sshll.u32 %s340_s24, 4  ;;  %s21_s25 = int_to_ptr.vmem [resolvable:$true] %s20_s25 }
   0x2   :  { %s326_s26 = scalar_lea.vmem %s21_s25, 512  ;;  %p331_p1 = scmp.lt.s32.totalorder %s21_s25, %s21_s25 }
   0x3   :  { %p327_p0 = scmp.ne.s32.totalorder %s21_s25, %s326_s26  ;;  %p332_p2 = scmp.lt.s32.totalorder %s326_s26, %s326_s26 }
   0x5   :  { %p333_p3 = por %p332_p2, %p331_p1 }
   0x7   :  { %p334_p4 = pnand %p333_p3, %p327_p0 }
   0x9   :  { %337 = shalt.err (!%p334_p4)
}
   0xa   :  { %s341_s27 = smov 128   ;;  %s342_s28 = smov 8  }
   0xb   :  { %26 = dma.hbm_to_vmem [thread:$0]  %s426_s1, 512, %s21_s25, [#allocation3], %s341_s27, %s341_s27, %s342_s28  }
   0xc   :  { %338 = dma.done.wait [#allocation3], 512  }
   0xd   :  { %339 = vsyncadd [#allocation3], 4294966784  ;;  %v343_v0 = vmov 0.0   ;;  %vm344_vm0 = vmmov 0   ;;  %v44_v1 = vld [vmem:[#allocation2 + $0x18] sm:$0xff]  ;;  %v43_v2 = vld [vmem:[#allocation2 + $0x10] sm:$0xff] }
   0xe   :  { %288 = vmatprep.subr.mxu0 %v343_v0  ;;  %296 = vmatprep.mubr.msk.f32.mxu0 %vm344_vm0, %v343_v0  ;;  %v42_v3 = vld [vmem:[#allocation2 + $0x8] sm:$0xff]  ;;  %v41_v4 = vld [vmem:[#allocation2] sm:$0xff]  ;;  %vm52_vm1 = vcmask 261120   ;;  %vm126_vm2 = vcmask 523264   ;;  %v345_v15 = vmov 0   ;;  %vm265_vm3 = vcmask 64512  }
   0xf   :  { %289 = vmatpush3.msra.mxu0 %v44_v1  ;;  %v40_v5 = vld [vmem:[%s425_s0] sm:$0xff]  ;;  %310 = vset.pattern.permute.xlu1 %v345_v15  ;;  %v162_v16 = vld [vmem:[%s431_s6 + $0x8] sm:$0xff] }
  0x10   :  { %290 = vmatprep.subr.mxu0 %v343_v0  ;;  %v273_v6 = vld [vmem:[%s427_s2] ss:$0 sm:$0xff]  ;;  %311 = vset.pattern.permute.xlu0 %v345_v15  ;;  %v160_v32 = vld [vmem:[%s430_s5 + $0x8] sm:$0xff] }
  0x11   :  { %291 = vmatpush3.msra.mxu0 %v43_v2  ;;  %v159_v13 = vld [vmem:[%s430_s5] sm:$0xff] }
  0x12   :  { %292 = vmatprep.subr.mxu0 %v343_v0  ;;  %301 = vmatprep.mubr.msk.f32.mxu1 %vm126_vm2, %v159_v13  ;;  %v161_v14 = vld [vmem:[%s431_s6] sm:$0xff] }
  0x13   :  { %293 = vmatpush3.msra.mxu0 %v42_v3  ;;  %165 = vperm.xlu1 %310, %v161_v14   ;;  %v275_v26 = vld [vmem:[%s428_s3] ss:$0 sm:$0xff] }
  0x14   :  { %294 = vmatprep.subr.mxu0 %v343_v0  ;;  %v276_v28 = vld [vmem:[%s429_s4] ss:$0 sm:$0xff] }
  0x15   :  { %295 = vmatpush3.msra.mxu0 %v41_v4 }
  0x16   :  { %297 = vmatmul.mubr.msk.f32.vlgmr.msra.gmra.mxu0 %vm52_vm1, %v40_v5 }
  0x17   :  { %170 = vperm.xlu1 %310, %v162_v16  }
  0x8e   :  { %v166_v33 = vpop.permute.xlu1 %165 }
  0x92   :  { %v171_v34 = vpop.permute.xlu1 %170 }
  0xd6   :  { %v122_v7 = vpop.f32.mrf.mxu0 }
  0xd7   :  { %v123_v8 = vadd.f32 %v273_v6, %v122_v7 }
  0xd8   :  { %v298_v9 = vpop.f32.mrf.mxu0 }
  0xd9   :  { %v127_v10 = vsel %vm126_vm2, %v123_v8, 0.0  ;;  %v131_v11 = vmul.f32 %v123_v8, %v123_v8 }
  0xda   :  { %128 = vadd.xlane.f32.xlu0 %v127_v10 }
  0xdb   :  { %v132_v12 = vsel %vm126_vm2, %v131_v11, 0.0 }
  0xde   :  { %133 = vadd.xlane.f32.xlu0 %v132_v12 }
 0x163   :  { %v129_v17 = vpop.xlane.xlu0 %128 }
 0x164   :  { %v130_v18 = vmul.f32 0.015625, %v129_v17 }
 0x166   :  { %v136_v20 = vmul.f32 %v130_v18, %v130_v18  ;;  %v138_v24 = vsub.f32 %v123_v8, %v130_v18 }
 0x167   :  { %v134_v19 = vpop.xlane.xlu0 %133 }
 0x168   :  { %v135_v21 = vmul.f32 0.015625, %v134_v19 }
 0x16a   :  { %v137_v22 = vsub.f32 %v135_v21, %v136_v20 }
 0x16c   :  { %v139_v23 = vadd.f32 1e-05, %v137_v22 }
 0x16e   :  { %312 = vrsqrt.f32 %v139_v23 }
 0x17b   :  { %v313_v25 = vpop.eup %312 }
 0x17c   :  { %v141_v27 = vmul.f32 %v313_v25, %v138_v24 }
 0x17e   :  { %v149_v29 = vmul.f32 %v275_v26, %v141_v27 }
 0x180   :  { %v157_v30 = vadd.f32 %v276_v28, %v149_v29 }
 0x182   :  { %v158_v31 = vmax.f32 %v157_v30, 0.0 }
 0x184   :  { %299 = vmatprep.subr.msk.mxu1 %vm126_vm2, %v158_v31 }
 0x185   :  { %300 = vmatpush3.xpose.msk.msra.mxu1 %vm126_vm2, %v158_v31 }
 0x188   :  { %302 = vmatmul.mubr.msk.f32.vlgmr.msra.gmra.mxu1 %vm126_vm2, %v160_v32 }
 0x248   :  { %v303_v35 = vpop.f32.mrf.mxu1 }
 0x249   :  { %v254_v36 = vadd.f32 %v303_v35, %v171_v34 }
 0x24a   :  { %v248_v37 = vpop.f32.mrf.mxu1 }
 0x24b   :  { %v258_v38 = vmul.f32 0.5, %v254_v36  ;;  %v249_v39 = vadd.f32 %v248_v37, %v166_v33 }
 0x24d   :  { %314 = vtanh.f32 %v258_v38  ;;  %v257_v40 = vmul.f32 0.5, %v249_v39 }
 0x24f   :  { %316 = vtanh.f32 %v257_v40 }
 0x25a   :  { %v315_v41 = vpop.eup %314 }
 0x25b   :  { %v262_v42 = vadd.f32 1.0, %v315_v41 }
 0x25c   :  { %v317_v43 = vpop.eup %316 }
 0x25d   :  { %v264_v44 = vmul.f32 0.5, %v262_v42  ;;  %v261_v45 = vadd.f32 1.0, %v317_v43 }
 0x25f   :  { %267 = vst.msk [vmem:[%s432_s7 + $0x8] sm:$0xff] %vm265_vm3, %v264_v44  ;;  %v263_v46 = vmul.f32 0.5, %v261_v45 }
 0x261   :  { %266 = vst.msk [vmem:[%s432_s7] sm:$0xff] %vm265_vm3, %v263_v46 }
 0x262   :  { %272 = vsyncpa [#allocation3], 1 }

</bundles_post_ra>
